<compile_context>
chip_gen: v5e
topology: v5e:2x2
jax: 0.10.0
libtpu: 0.0.40
codegen_flags: <defaults>
</compile_context>

<pallas_src>
import functools

import jax
import jax.numpy as jnp
from jax.experimental import pallas as pl
from jax.experimental.pallas import tpu as pltpu


def _round_up(n, m):
    return ((n + m - 1) // m) * m


def _stable_softplus(x):
    # == log1p(exp(x)) without overflow for large x (matches F.softplus default).
    return jnp.maximum(x, 0.0) + jnp.log1p(jnp.exp(-jnp.abs(x)))


# ----------------------------------------------------------------------------- #
# One-time parameter packing (layout + sigma hoisting). Not in the hot path.
# ----------------------------------------------------------------------------- #
def pack_params(params, d_pad=128, dtype=jnp.float32):
    """Pack all 18 per-layer tensors into two contiguous lane-dense buffers.

    Returns:
      w_pack: (3, 3, Kp, d_pad)  [kind(mu,sigma,eps), layer, in, out], weights
              transposed to (in, out); in-dim padded only to Kp = round_up(max in, 8),
              out-dim padded to d_pad.
      b_pack: (3, 8, d_pad)      [kind, layer-row (rows 3..7 zero), out].
      real_dims: ((in0, out0), (in1, out1), (in2, out2)) real feature widths.
    """
    real_dims = []
    for i in range(1, 4):
        out_f, in_f = params[f"w{i}_mu"].shape
        real_dims.append((int(in_f), int(out_f)))
    k_pad = _round_up(max(ki for ki, _ in real_dims), 8)
    assert k_pad <= d_pad, "layer input widths must be <= 128 for this packing"
    assert all(ko <= d_pad for _, ko in real_dims), "layer output widths must be <= 128"

    w_kind = {"mu": [], "sigma": [], "eps": []}
    b_kind = {"mu": [], "sigma": [], "eps": []}
    for i, (in_f, out_f) in enumerate(real_dims, start=1):
        wpad = ((0, k_pad - in_f), (0, d_pad - out_f))
        w_kind["mu"].append(jnp.pad(params[f"w{i}_mu"].T, wpad))
        w_kind["sigma"].append(jnp.pad(_stable_softplus(params[f"w{i}_rho"]).T, wpad))
        w_kind["eps"].append(jnp.pad(params[f"w{i}_eps"].T, wpad))
        bpad = (0, d_pad - out_f)
        b_kind["mu"].append(jnp.pad(params[f"b{i}_mu"], bpad))
        b_kind["sigma"].append(jnp.pad(_stable_softplus(params[f"b{i}_rho"]), bpad))
        b_kind["eps"].append(jnp.pad(params[f"b{i}_eps"], bpad))

    kinds = ("mu", "sigma", "eps")
    w_pack = jnp.stack([jnp.stack(w_kind[k]) for k in kinds]).astype(dtype)      # (3,3,Kp,128)
    b_rows = jnp.stack([jnp.stack(b_kind[k]) for k in kinds])                    # (3,3,128)
    b_pack = jnp.pad(b_rows, ((0, 0), (0, 8 - len(real_dims)), (0, 0))).astype(dtype)  # (3,8,128)
    return w_pack, b_pack, tuple(real_dims)


# ----------------------------------------------------------------------------- #
# Kernel: one M-tile of the full 3-layer forward per grid step.
# ----------------------------------------------------------------------------- #
def bayesian_mlp_kernel(x_ref, w_ref, b_ref, out_ref, *, layer_dims):
    # Reparameterization: W = mu + sigma * eps (sigma precomputed -> pure VPU FMA).
    # One dense FMA over the whole shrunken pack; redone per grid step so the M axis
    # can stay "parallel" (no @pl.when(pid==0) scratch hazard on v7x megacore).
    w_all = w_ref[0] + w_ref[1] * w_ref[2]          # (3, Kp, 128)
    b_all = b_ref[0] + b_ref[1] * b_ref[2]          # (8, 128)

    h = x_ref[...]                                  # (tile_m, in_size), f32
    n_layers = len(layer_dims)
    for l, (k_in, k_out) in enumerate(layer_dims):
        w = w_all[l, :k_in, :k_out]                 # static slice of the reparam result
        b = b_all[l:l + 1, :k_out]                  # (1, k_out)
        # With f32 packs the astype is a no-op; with bf16 packs only the small
        # activation is cast (weights are already bf16 -> no in-kernel weight casts).
        h = jnp.dot(h.astype(w.dtype), w, preferred_element_type=jnp.float32) + b
        if l < n_layers - 1:
            h = jnp.maximum(h, 0.0)
    out_ref[...] = h.astype(out_ref.dtype)          # lane-dense (tile_m, 128) store


# ----------------------------------------------------------------------------- #
# Wrapper: M-tiled "parallel" grid; weights stay VMEM-resident (constant index_map).
# ----------------------------------------------------------------------------- #
def deep_bayesian_forward(x, w_pack, b_pack, real_dims, output_size, *, tile_m=256):
    B, in_size = x.shape
    assert in_size == real_dims[0][0], "x feature dim must match layer-1 input width"
    D = int(w_pack.shape[-1])

    tm = min(tile_m, _round_up(B, 8))
    Bp = _round_up(B, tm)
    xp = x if Bp == B else jnp.pad(x, ((0, Bp - B), (0, 0)))

    # Final layer emits the full padded lane width -> unmasked lane-dense output store;
    # intermediate layers keep their real widths.
    kernel_dims = (real_dims[0], real_dims[1], (real_dims[2][0], D))

    itemsize = jnp.dtype(w_pack.dtype).itemsize
    flops = 2 * Bp * sum(ki * ko for ki, ko in kernel_dims) + 2 * (w_pack.size + b_pack.size) // 3
    bytes_accessed = xp.size * 4 + (w_pack.size + b_pack.size) * itemsize + Bp * D * 4

    kernel = functools.partial(bayesian_mlp_kernel, layer_dims=kernel_dims)
    out_pad = pl.pallas_call(
        kernel,
        out_shape=jax.ShapeDtypeStruct((Bp, D), jnp.float32),
        grid=(Bp // tm,),
        in_specs=[
            pl.BlockSpec((tm, in_size), lambda i: (i, 0)),
            pl.BlockSpec(w_pack.shape, lambda i: (0, 0, 0, 0)),   # constant -> VMEM-resident
            pl.BlockSpec(b_pack.shape, lambda i: (0, 0, 0)),      # constant -> VMEM-resident
        ],
        out_specs=pl.BlockSpec((tm, D), lambda i: (i, 0)),
        compiler_params=pltpu.CompilerParams(dimension_semantics=("parallel",)),
        cost_estimate=pl.CostEstimate(
            flops=flops, transcendentals=0, bytes_accessed=bytes_accessed),
    )(xp, w_pack, b_pack)
    return out_pad[:B, :output_size]


# ----------------------------------------------------------------------------- #
# Synthetic parameters + pure-JAX reference (mirrors the PyTorch module).
# ----------------------------------------------------------------------------- #
def init_params(key, input_size, hidden1, hidden2, output_size):
    """mu ~ N(0, 0.1), rho ~= -7 (small jitter), eps ~ N(0, 1) (the sampled noise)."""
    sizes = [(hidden1, input_size), (hidden2, hidden1), (output_size, hidden2)]
    params = {}
    for i, (out_f, in_f) in enumerate(sizes, start=1):
        key, *ks = jax.random.split(key, 7)
        params[f"w{i}_mu"] = 0.1 * jax.random.normal(ks[0], (out_f, in_f), jnp.float32)
        params[f"w{i}_rho"] = -7.0 + 0.1 * jax.random.normal(ks[1], (out_f, in_f), jnp.float32)
        params[f"w{i}_eps"] = jax.random.normal(ks[2], (out_f, in_f), jnp.float32)
        params[f"b{i}_mu"] = 0.1 * jax.random.normal(ks[3], (out_f,), jnp.float32)
        params[f"b{i}_rho"] = -7.0 + 0.1 * jax.random.normal(ks[4], (out_f,), jnp.float32)
        params[f"b{i}_eps"] = jax.random.normal(ks[5], (out_f,), jnp.float32)
    return params


def reference_forward(x, params):
    h = x
    for i in range(1, 4):
        w = params[f"w{i}_mu"] + jnp.log1p(jnp.exp(params[f"w{i}_rho"])) * params[f"w{i}_eps"]
        b = params[f"b{i}_mu"] + jnp.log1p(jnp.exp(params[f"b{i}_rho"])) * params[f"b{i}_eps"]
        h = h @ w.T + b
        if i < 3:
            h = jnp.maximum(h, 0.0)
    return h


if __name__ == "__main__":
    batch, input_size, hidden1, hidden2, output_size = 8, 16, 32, 32, 4

    key = jax.random.PRNGKey(0)
    key_x, key_p, key_xl = jax.random.split(key, 3)
    x = jax.random.normal(key_x, (batch, input_size), jnp.float32)
    params = init_params(key_p, input_size, hidden1, hidden2, output_size)

    # One-time relayout / sigma precompute (not in the per-forward hot path).
    w_pack, b_pack, real_dims = pack_params(params)                     # f32 (v5e-friendly)
    w_bf16, b_bf16, _ = pack_params(params, dtype=jnp.bfloat16)         # v6e/v7x fast path

    ref = reference_forward(x, params)

    # f32 path: bit-faithful to the module semantics.
    out = jax.block_until_ready(
        deep_bayesian_forward(x, w_pack, b_pack, real_dims, output_size))
    assert out.shape == (batch, output_size)
    assert jnp.allclose(out, ref, atol=1e-4, rtol=1e-4), "f32 kernel mismatch vs reference"

    # bf16-packed path (v6e/v7x): bf16 reparam + bf16 MXU operands, f32 accumulation.
    out_bf16 = jax.block_until_ready(
        deep_bayesian_forward(x, w_bf16, b_bf16, real_dims, output_size))
    assert jnp.allclose(out_bf16, ref, atol=5e-2, rtol=5e-2), "bf16 kernel mismatch vs reference"

    # Larger batch (e.g. MC samples folded into M): exercises the tiled "parallel" grid
    # (300 rows -> padded to 384 -> 3 grid steps at tile_m=128) and row padding.
    xl = jax.random.normal(key_xl, (300, input_size), jnp.float32)
    ref_l = reference_forward(xl, params)
    out_l = jax.block_until_ready(
        deep_bayesian_forward(xl, w_pack, b_pack, real_dims, output_size, tile_m=128))
    assert jnp.allclose(out_l, ref_l, atol=1e-4, rtol=1e-4), "tiled kernel mismatch vs reference"

    print("KERNEL_OK")
</pallas_src>

<mosaic_0001>
module attributes {stable_mosaic.version = 11 : i64} {
  func.func @bayesian_mlp_kernel(%arg0: i32, %arg1: memref<8x16xf32, #tpu.memory_space<vmem>>, %arg2: memref<3x3x32x128xf32, #tpu.memory_space<vmem>>, %arg3: memref<3x8x128xf32, #tpu.memory_space<vmem>>, %arg4: memref<8x128xf32, #tpu.memory_space<vmem>>) attributes {dimension_semantics = [#tpu.dimension_semantics<parallel>], iteration_bounds = array<i64: 1>, scalar_prefetch = 0 : i64, scratch_operands = 0 : i64, tpu.core_type = #tpu.core_type<tc>, window_params = [{transform_indices = @transform_0, window_bounds = array<i64: 8, 16>}, {pipeline_mode = #tpu.pipeline_mode<synchronous>, transform_indices = @transform_1, window_bounds = array<i64: 3, 3, 32, 128>}, {pipeline_mode = #tpu.pipeline_mode<synchronous>, transform_indices = @transform_2, window_bounds = array<i64: 3, 8, 128>}, {transform_indices = @transform_3, window_bounds = array<i64: 8, 128>}]} {
    %c0 = arith.constant 0 : index
    %c0_0 = arith.constant 0 : index
    %c0_1 = arith.constant 0 : index
    %c0_2 = arith.constant 0 : index
    %0 = vector.load %arg2[%c0, %c0_0, %c0_1, %c0_2] : memref<3x3x32x128xf32, #tpu.memory_space<vmem>>, vector<1x3x32x128xf32>
    %1 = vector.shape_cast %0 : vector<1x3x32x128xf32> to vector<3x32x128xf32>
    %c1 = arith.constant 1 : index
    %c0_3 = arith.constant 0 : index
    %c0_4 = arith.constant 0 : index
    %c0_5 = arith.constant 0 : index
    %2 = vector.load %arg2[%c1, %c0_3, %c0_4, %c0_5] : memref<3x3x32x128xf32, #tpu.memory_space<vmem>>, vector<1x3x32x128xf32>
    %3 = vector.shape_cast %2 : vector<1x3x32x128xf32> to vector<3x32x128xf32>
    %c2 = arith.constant 2 : index
    %c0_6 = arith.constant 0 : index
    %c0_7 = arith.constant 0 : index
    %c0_8 = arith.constant 0 : index
    %4 = vector.load %arg2[%c2, %c0_6, %c0_7, %c0_8] : memref<3x3x32x128xf32, #tpu.memory_space<vmem>>, vector<1x3x32x128xf32>
    %5 = vector.shape_cast %4 : vector<1x3x32x128xf32> to vector<3x32x128xf32>
    %6 = arith.mulf %3, %5 : vector<3x32x128xf32>
    %7 = arith.addf %1, %6 : vector<3x32x128xf32>
    %c0_9 = arith.constant 0 : index
    %c0_10 = arith.constant 0 : index
    %c0_11 = arith.constant 0 : index
    %8 = vector.load %arg3[%c0_9, %c0_10, %c0_11] : memref<3x8x128xf32, #tpu.memory_space<vmem>>, vector<1x8x128xf32>
    %9 = vector.shape_cast %8 : vector<1x8x128xf32> to vector<8x128xf32>
    %c1_12 = arith.constant 1 : index
    %c0_13 = arith.constant 0 : index
    %c0_14 = arith.constant 0 : index
    %10 = vector.load %arg3[%c1_12, %c0_13, %c0_14] : memref<3x8x128xf32, #tpu.memory_space<vmem>>, vector<1x8x128xf32>
    %11 = vector.shape_cast %10 : vector<1x8x128xf32> to vector<8x128xf32>
    %c2_15 = arith.constant 2 : index
    %c0_16 = arith.constant 0 : index
    %c0_17 = arith.constant 0 : index
    %12 = vector.load %arg3[%c2_15, %c0_16, %c0_17] : memref<3x8x128xf32, #tpu.memory_space<vmem>>, vector<1x8x128xf32>
    %13 = vector.shape_cast %12 : vector<1x8x128xf32> to vector<8x128xf32>
    %14 = arith.mulf %11, %13 : vector<8x128xf32>
    %15 = arith.addf %9, %14 : vector<8x128xf32>
    %c0_18 = arith.constant 0 : index
    %c0_19 = arith.constant 0 : index
    %16 = vector.load %arg1[%c0_18, %c0_19] : memref<8x16xf32, #tpu.memory_space<vmem>>, vector<8x16xf32>
    %17 = vector.extract_strided_slice %7 {offsets = [0, 0, 0], sizes = [1, 16, 32], strides = [1, 1, 1]} : vector<3x32x128xf32> to vector<1x16x32xf32>
    %18 = vector.shape_cast %17 : vector<1x16x32xf32> to vector<16x32xf32>
    %19 = vector.extract_strided_slice %15 {offsets = [0, 0], sizes = [1, 32], strides = [1, 1]} : vector<8x128xf32> to vector<1x32xf32>
    %cst = arith.constant dense<0.000000e+00> : vector<8x32xf32>
    %20 = tpu.matmul %16, %18, %cst {dimension_numbers = #tpu.dot_dimension_numbers<[1], [0], [0], [1], [0, 0, 1, 1], [], []>} : vector<8x16xf32>, vector<16x32xf32>, vector<8x32xf32> -> vector<8x32xf32>
    %21 = vector.broadcast %19 : vector<1x32xf32> to vector<8x32xf32>
    %22 = arith.addf %20, %21 : vector<8x32xf32>
    %cst_20 = arith.constant 0.000000e+00 : f32
    %23 = vector.broadcast %cst_20 : f32 to vector<8x32xf32>
    %24 = arith.maximumf %22, %23 : vector<8x32xf32>
    %25 = vector.extract_strided_slice %7 {offsets = [1, 0, 0], sizes = [1, 32, 32], strides = [1, 1, 1]} : vector<3x32x128xf32> to vector<1x32x32xf32>
    %26 = vector.shape_cast %25 : vector<1x32x32xf32> to vector<32x32xf32>
    %27 = vector.extract_strided_slice %15 {offsets = [1, 0], sizes = [1, 32], strides = [1, 1]} : vector<8x128xf32> to vector<1x32xf32>
    %cst_21 = arith.constant dense<0.000000e+00> : vector<8x32xf32>
    %28 = tpu.matmul %24, %26, %cst_21 {dimension_numbers = #tpu.dot_dimension_numbers<[1], [0], [0], [1], [0, 0, 1, 1], [], []>} : vector<8x32xf32>, vector<32x32xf32>, vector<8x32xf32> -> vector<8x32xf32>
    %29 = vector.broadcast %27 : vector<1x32xf32> to vector<8x32xf32>
    %30 = arith.addf %28, %29 : vector<8x32xf32>
    %cst_22 = arith.constant 0.000000e+00 : f32
    %31 = vector.broadcast %cst_22 : f32 to vector<8x32xf32>
    %32 = arith.maximumf %30, %31 : vector<8x32xf32>
    %33 = vector.extract_strided_slice %7 {offsets = [2, 0, 0], sizes = [1, 32, 128], strides = [1, 1, 1]} : vector<3x32x128xf32> to vector<1x32x128xf32>
    %34 = vector.shape_cast %33 : vector<1x32x128xf32> to vector<32x128xf32>
    %35 = vector.extract_strided_slice %15 {offsets = [2, 0], sizes = [1, 128], strides = [1, 1]} : vector<8x128xf32> to vector<1x128xf32>
    %cst_23 = arith.constant dense<0.000000e+00> : vector<8x128xf32>
    %36 = tpu.matmul %32, %34, %cst_23 {dimension_numbers = #tpu.dot_dimension_numbers<[1], [0], [0], [1], [0, 0, 1, 1], [], []>} : vector<8x32xf32>, vector<32x128xf32>, vector<8x128xf32> -> vector<8x128xf32>
    %37 = vector.broadcast %35 : vector<1x128xf32> to vector<8x128xf32>
    %38 = arith.addf %36, %37 : vector<8x128xf32>
    %c0_24 = arith.constant 0 : index
    %c0_25 = arith.constant 0 : index
    %39 = vector.load %arg4[%c0_24, %c0_25] : memref<8x128xf32, #tpu.memory_space<vmem>>, vector<8x128xf32>
    tpu.vector_store %arg4[%c0_24, %c0_25], %38 {strides = array<i32>} : memref<8x128xf32, #tpu.memory_space<vmem>>, vector<8x128xf32>,
    return
  }
  func.func @transform_0(%arg0: i32) -> (i32, i32) {
    %c0_i32 = arith.constant 0 : i32
    %c0_i32_0 = arith.constant 0 : i32
    return %arg0, %c0_i32 : i32, i32
  }
  func.func @transform_1(%arg0: i32) -> (i32, i32, i32, i32) {
    %c0_i32 = arith.constant 0 : i32
    %c0_i32_0 = arith.constant 0 : i32
    %c0_i32_1 = arith.constant 0 : i32
    %c0_i32_2 = arith.constant 0 : i32
    %c0_i32_3 = arith.constant 0 : i32
    return %c0_i32, %c0_i32_0, %c0_i32_1, %c0_i32_2 : i32, i32, i32, i32
  }
  func.func @transform_2(%arg0: i32) -> (i32, i32, i32) {
    %c0_i32 = arith.constant 0 : i32
    %c0_i32_0 = arith.constant 0 : i32
    %c0_i32_1 = arith.constant 0 : i32
    %c0_i32_2 = arith.constant 0 : i32
    return %c0_i32, %c0_i32_0, %c0_i32_1 : i32, i32, i32
  }
  func.func @transform_3(%arg0: i32) -> (i32, i32) {
    %c0_i32 = arith.constant 0 : i32
    %c0_i32_0 = arith.constant 0 : i32
    return %arg0, %c0_i32 : i32, i32
  }
}

</mosaic_0001>

<bundles_post_ra>
// kernel: tpu_custom_call.1
= control target key start
LH: loop header
LB: loop body
LE: loop exit
PB: predicated region body
PF: predicated region fallthrough
CT: control target
= control target key end

     0   :  { %8 = vsyncpa [#allocation3], 0  ;;  %s366_s0 = inlined_call_operand.hbm [shape: f32[8,16], index: 0, kind: input, shape index: {}]   ;;  %s367_s1 = inlined_call_operand.hbm [shape: f32[3,3,32,128], index: 1, kind: input, shape index: {}]   ;;  %s368_s2 = inlined_call_operand.hbm [shape: f32[3,8,128], index: 2, kind: input, shape index: {}]   ;;  %s369_s3 = inlined_call_operand.hbm [shape: f32[8,128], index: 3, kind: output, shape index: {}]  }
   0x1   :  { %9 = vsyncpa [#allocation6], 0  ;;  %s26_s14 = sshll.u32 %s367_s1, 4  ;;  %s27_s14 = int_to_ptr.hbm [resolvable:$true] %s26_s14 }
   0x2   :  { %10 = vsyncpa [#allocation4], 0  ;;  %s326_s15 = smov [#allocation5]   ;;  %s16_s19 = sshll.u32 %s366_s0, 4  ;;  %s17_s19 = int_to_ptr.hbm [resolvable:$true] %s16_s19 }
   0x3   :  { %s28_s16 = sshll.u32 %s326_s15, 4  ;;  %s327_s20 = smov 128   ;;  %s29_s16 = int_to_ptr.vmem [resolvable:$true] %s28_s16 }
   0x4   :  { %s328_s21 = smov 8   ;;  %s329_s22 = smov [#allocation2]  }
   0x5   :  { %34 = dma.hbm_to_vmem [thread:$0]  %s27_s14, 4608, %s29_s16, [#allocation6], %s327_s20, %s327_s20, %s328_s21  }
   0x6   :  { %s18_s23 = sshll.u32 %s329_s22, 4  ;;  %s39_s26 = sshll.u32 %s368_s2, 4  ;;  %s19_s23 = int_to_ptr.vmem [resolvable:$true] %s18_s23  ;;  %s40_s26 = int_to_ptr.hbm [resolvable:$true] %s39_s26 }
   0x7   :  { %21 = dma.hbm_to_vmem [thread:$0]  %s17_s19, 128, %s19_s23, [#allocation3]  }
   0x8   :  { %s330_s1 = smov [#allocation7]  }
   0x9   :  { %s41_s27 = sshll.u32 %s330_s1, 4  ;;  %s42_s27 = int_to_ptr.vmem [resolvable:$true] %s41_s27 }
   0xa   :  { %47 = dma.hbm_to_vmem [thread:$0]  %s40_s26, 384, %s42_s27, [#allocation6], %s327_s20, %s327_s20, %s328_s21  }
   0xb   :  { %320 = dma.done.wait [#allocation3], 128  }
   0xc   :  { %321 = vsyncadd [#allocation3], 4294967168 }
   0xd   :  { %322 = dma.done.wait [#allocation6], 4992  }
   0xe   :  { %323 = vsyncadd [#allocation6], 4294962304  ;;  %v61_v0 = vld [vmem:[#allocation5 + $0x8] sm:$0xff]  ;;  %v60_v4 = vld [vmem:[#allocation5] sm:$0xff]  ;;  %vm121_vm0 = vcmask 130048   ;;  %vm147_vm1 = vcmask 261120  }
   0xf   :  { %v72_v1 = vld [vmem:[#allocation5 + $0x68] sm:$0xff]  ;;  %v71_v5 = vld [vmem:[#allocation5 + $0x60] sm:$0xff]  ;;  %v76_v8 = vld [vmem:[#allocation5 + $0x98] sm:$0xff]  ;;  %s331_s0 = smov [#allocation8]   ;;  %s204_s30 = sshll.u32 %s369_s3, 4  ;;  %s205_s30 = int_to_ptr.hbm [resolvable:$true] %s204_s30 }
  0x10   :  { %v83_v2 = vld [vmem:[#allocation5 + $0xc8] sm:$0xff]  ;;  %v82_v6 = vld [vmem:[#allocation5 + $0xc0] sm:$0xff]  ;;  %v65_v10 = vld [vmem:[#allocation5 + $0x38] sm:$0xff]  ;;  %s202_s2 = sshll.u32 %s331_s0, 4  ;;  %s203_s2 = int_to_ptr.vmem [resolvable:$true] %s202_s2 }
  0x11   :  { %v93_v3 = vmul.f32 %v83_v2, %v72_v1  ;;  %v92_v7 = vmul.f32 %v82_v6, %v71_v5  ;;  %v87_v11 = vld [vmem:[#allocation5 + $0xf8] sm:$0xff]  ;;  %v75_v16 = vld [vmem:[#allocation5 + $0x90] sm:$0xff]  ;;  %v74_v20 = vld [vmem:[#allocation5 + $0x88] sm:$0xff] }
  0x12   :  { %v97_v13 = vmul.f32 %v87_v11, %v76_v8  ;;  %v119_v14 = vld [vmem:[#allocation2] sm:$0xff]  ;;  %v86_v17 = vld [vmem:[#allocation5 + $0xf0] sm:$0xff]  ;;  %v85_v21 = vld [vmem:[#allocation5 + $0xe8] sm:$0xff] }
  0x13   :  { %v103_v9 = vadd.f32 %v93_v3, %v61_v0  ;;  %v102_v12 = vadd.f32 %v92_v7, %v60_v4  ;;  %v96_v18 = vmul.f32 %v86_v17, %v75_v16  ;;  %v64_v19 = vld [vmem:[#allocation5 + $0x30] sm:$0xff]  ;;  %v95_v23 = vmul.f32 %v85_v21, %v74_v20  ;;  %v63_v24 = vld [vmem:[#allocation5 + $0x28] sm:$0xff]  ;;  %v73_v25 = vld [vmem:[#allocation5 + $0x80] sm:$0xff] }
  0x14   :  { %v107_v15 = vadd.f32 %v97_v13, %v65_v10  ;;  %v84_v26 = vld [vmem:[#allocation5 + $0xe0] sm:$0xff]  ;;  %v69_v31 = vld [vmem:[#allocation5 + $0x58] sm:$0xff]  ;;  %v114_v36 = vld [vmem:[#allocation7 + $0x8] sm:$0xff] }
  0x15   :  { %139 = vmatpush.msra.mxu0 %v103_v9  ;;  %v106_v22 = vadd.f32 %v96_v18, %v64_v19  ;;  %v105_v27 = vadd.f32 %v95_v23, %v63_v24  ;;  %v94_v28 = vmul.f32 %v84_v26, %v73_v25  ;;  %v62_v29 = vld [vmem:[#allocation5 + $0x20] sm:$0xff]  ;;  %v80_v32 = vld [vmem:[#allocation5 + $0xb8] sm:$0xff]  ;;  %v116_v37 = vld [vmem:[#allocation7 + $0x10] sm:$0xff] }
  0x16   :  { %163 = vmatpush.msra.mxu1 %v107_v15  ;;  %v91_v33 = vld [vmem:[#allocation5 + $0x118] sm:$0xff]  ;;  %v117_v38 = vmul.f32 %v116_v37, %v114_v36  ;;  %v112_v39 = vld [vmem:[#allocation7] sm:$0xff]  ;;  %v79_v45 = vld [vmem:[#allocation5 + $0xb0] sm:$0xff] }
  0x17   :  { %140 = vmatpush.msra.mxu0 %v102_v12  ;;  %v104_v30 = vadd.f32 %v94_v28, %v62_v29  ;;  %v101_v34 = vmul.f32 %v91_v33, %v80_v32  ;;  %v90_v46 = vld [vmem:[#allocation5 + $0x110] sm:$0xff]  ;;  %v78_v49 = vld [vmem:[#allocation5 + $0xa8] sm:$0xff]  ;;  %v77_v54 = vld [vmem:[#allocation5 + $0xa0] sm:$0xff] }
  0x18   :  { %215 = vmatmul.msk.f32.vlgmr.msra.gmra.mxu0 %vm121_vm0, %v119_v14  ;;  %164 = vmatpush.msra.mxu1 %v106_v22  ;;  %v118_v40 = vadd.f32 %v117_v38, %v112_v39  ;;  %v100_v47 = vmul.f32 %v90_v46, %v79_v45  ;;  %v68_v48 = vld [vmem:[#allocation5 + $0x50] sm:$0xff]  ;;  %v89_v50 = vld [vmem:[#allocation5 + $0x108] sm:$0xff]  ;;  %v88_v55 = vld [vmem:[#allocation5 + $0x100] sm:$0xff] }
  0x19   :  { %v111_v35 = vadd.f32 %v101_v34, %v69_v31  ;;  %v99_v52 = vmul.f32 %v89_v50, %v78_v49  ;;  %v67_v53 = vld [vmem:[#allocation5 + $0x48] sm:$0xff]  ;;  %v98_v57 = vmul.f32 %v88_v55, %v77_v54  ;;  %v66_v58 = vld [vmem:[#allocation5 + $0x40] sm:$0xff] }
  0x1a   :  { %165 = vmatpush.msra.mxu1 %v105_v27  ;;  %v120_v41 = vperm.slane %v118_v40, 0  ;;  %v110_v51 = vadd.f32 %v100_v47, %v68_v48  ;;  %v146_v60 = vperm.slane %v118_v40, 1  ;;  %v172_v0 = vperm.slane %v118_v40, 2 }
  0x1b   :  { %188 = vmatpush.msra.mxu2 %v111_v35  ;;  %v109_v56 = vadd.f32 %v99_v52, %v67_v53  ;;  %v108_v59 = vadd.f32 %v98_v57, %v66_v58 }
  0x1c   :  { %166 = vmatpush.msra.mxu1 %v104_v30 }
  0x1d   :  { %189 = vmatpush.msra.mxu2 %v110_v51 }
  0x1f   :  { %190 = vmatpush.msra.mxu2 %v109_v56 }
  0x21   :  { %191 = vmatpush.msra.mxu2 %v108_v59 }
  0x95   :  { %v142_v42 = vpop.f32.mrf.mxu0 }
  0x96   :  { %v143_v43 = vadd.f32 %v142_v42, %v120_v41 }
  0x98   :  { %v145_v44 = vmax.f32 %v143_v43, 0.0 }
  0x9a   :  { %216 = vmatmul.msk.f32.vlgmr.msra.gmra.mxu1 %vm147_vm1, %v145_v44 }
 0x117   :  { %v168_v61 = vpop.f32.mrf.mxu1 }
 0x118   :  { %v169_v62 = vadd.f32 %v168_v61, %v146_v60 }
 0x11a   :  { %v171_v63 = vmax.f32 %v169_v62, 0.0 }
 0x11c   :  { %217 = vmatmul.msk.f32.vlgmr.msra.gmra.mxu2 %vm147_vm1, %v171_v63 }
 0x19f   :  { %v193_v1 = vpop.f32.mrf.mxu2 }
 0x1a0   :  { %v194_v2 = vadd.f32 %v193_v1, %v172_v0 }
 0x1a2   :  { %196 = vst [vmem:[#allocation8] sm:$0xff] %v194_v2 }
 0x1a3   :  { %207 = dma.vmem_to_hbm [thread:$0]  %s203_s2, 128, %s205_s30, [#allocation4]  }
 0x1a4   :  { %324 = dma.done.wait [#allocation4], 128  }
 0x1a5   :  { %325 = vsyncadd [#allocation4], 4294967168 }
 0x1a6   :  { %212 = vsyncpa [#allocation3], 1 }
 0x1a7   :  { %213 = vsyncpa [#allocation6], 1 }
 0x1a8   :  { %214 = vsyncpa [#allocation4], 1 }

</bundles_post_ra>
